<compile_context>
chip_gen: v7x
topology: tpu7x:2x2x1
jax: 0.10.0
libtpu: 0.0.40
codegen_flags: <defaults>
</compile_context>

<pallas_src>
import jax
import jax.numpy as jnp
from jax.experimental import pallas as pl
from jax.experimental.pallas import tpu as pltpu

OBS_SIZE = 6
ACTION_SIZE = 2
HIDDEN_SIZE = OBS_SIZE * 10  # 60


def ppo_forward_kernel(obs_ref, w1_ref, b1_ref, w2_ref, b2_ref, out_ref):
    # obs: (OBS, TB), w1: (HID, OBS), b1: (HID, 1),
    # w2: (ACT, HID), b2: (ACT, 1), out: (ACT, TB)
    x = obs_ref[...]

    # fc1 + ReLU  (bias broadcasts along the lane/batch axis)
    # NOTE: dot inputs kept in f32 to preserve 1e-5 parity with the reference;
    # casting x/w to bf16 (with f32 accumulation) would halve HBM bytes on v6e/v7x.
    h = jnp.dot(w1_ref[...], x, preferred_element_type=jnp.float32) + b1_ref[...]
    h = jnp.maximum(h, 0.0)

    # fc2
    logits = jnp.dot(w2_ref[...], h, preferred_element_type=jnp.float32) + b2_ref[...]

    # 2-class softmax closed form: p0 = sigmoid(l0 - l1), p1 = 1 - p0.
    # Avoids the cross-lane/sublane max+sum reductions of a generic softmax and
    # any dependence on padded-lane masking.  Numerically safe: exp overflow to
    # +inf gives p0 = 0, underflow gives p0 = 1.
    d = logits[1:2, :] - logits[0:1, :]          # (1, TB)
    p0 = 1.0 / (1.0 + jnp.exp(d))                # exact divide (keeps 1e-5 tolerance)
    out_ref[...] = jnp.concatenate([p0, 1.0 - p0], axis=0).astype(out_ref.dtype)


def prepare_params(w1, b1, w2, b2):
    """One-time conversion from PyTorch layout (weight (out, in), bias (out,))
    to kernel-ready layout.  Weights need no transpose in the feature-major
    formulation; biases become column vectors.  Hoisted out of the per-call path."""
    return (
        w1.astype(jnp.float32),                  # (HID, OBS)
        b1.reshape(-1, 1).astype(jnp.float32),   # (HID, 1)
        w2.astype(jnp.float32),                  # (ACT, HID)
        b2.reshape(-1, 1).astype(jnp.float32),   # (ACT, 1)
    )


def _round_up(x, m):
    return (x + m - 1) // m * m


def ppo_forward(obs, params, *, max_tb=1024):
    """obs: (B, OBS_SIZE) float32 (PyTorch row-major convention).
    params: output of prepare_params.  Returns (B, ACTION_SIZE) probabilities."""
    w1, b1c, w2, b2c = params
    B = obs.shape[0]

    # Layout plumbing (tiny): present a lane-dense (features, batch) slab to the
    # kernel.  Ideally the caller stores obs feature-major to skip this transpose.
    obs_t = obs.astype(jnp.float32).T            # (OBS, B)

    b128 = _round_up(max(B, 1), 128)
    tb = min(b128, max_tb)                       # batch tile on lanes (mult of 128)
    b_pad = _round_up(B, tb)
    if b_pad != B:
        obs_t = jnp.pad(obs_t, ((0, 0), (0, b_pad - B)))

    grid = (b_pad // tb,)

    out_t = pl.pallas_call(
        ppo_forward_kernel,
        out_shape=jax.ShapeDtypeStruct((ACTION_SIZE, b_pad), jnp.float32),
        grid=grid,
        in_specs=[
            pl.BlockSpec((OBS_SIZE, tb), lambda i: (0, i)),   # batch-tiled, lane-dense
            pl.BlockSpec(w1.shape, lambda i: (0, 0)),         # weights resident
            pl.BlockSpec(b1c.shape, lambda i: (0, 0)),
            pl.BlockSpec(w2.shape, lambda i: (0, 0)),
            pl.BlockSpec(b2c.shape, lambda i: (0, 0)),
        ],
        out_specs=pl.BlockSpec((ACTION_SIZE, tb), lambda i: (0, i)),
        compiler_params=pltpu.CompilerParams(
            # batch tiles are independent -> shard across v7x's 2 TensorCores
            dimension_semantics=("parallel",),
        ),
    )(obs_t, w1, b1c, w2, b2c)

    return out_t[:, :B].T                        # back to (B, ACTION_SIZE)


def init_params(key):
    """Deterministic init matching PyTorch Linear shapes: weight (out, in), bias (out,)."""
    k1, k2, k3, k4 = jax.random.split(key, 4)
    bound1 = 1.0 / jnp.sqrt(OBS_SIZE)
    bound2 = 1.0 / jnp.sqrt(HIDDEN_SIZE)
    w1 = jax.random.uniform(k1, (HIDDEN_SIZE, OBS_SIZE), jnp.float32, -bound1, bound1)
    b1 = jax.random.uniform(k2, (HIDDEN_SIZE,), jnp.float32, -bound1, bound1)
    w2 = jax.random.uniform(k3, (ACTION_SIZE, HIDDEN_SIZE), jnp.float32, -bound2, bound2)
    b2 = jax.random.uniform(k4, (ACTION_SIZE,), jnp.float32, -bound2, bound2)
    return w1, b1, w2, b2


def reference_forward(obs, w1, b1, w2, b2):
    h = jnp.maximum(obs @ w1.T + b1, 0.0)
    logits = h @ w2.T + b2
    return jax.nn.softmax(logits, axis=1)


if __name__ == "__main__":
    key = jax.random.PRNGKey(0)
    pkey, okey1, okey2 = jax.random.split(key, 3)
    w1, b1, w2, b2 = init_params(pkey)
    params = prepare_params(w1, b1, w2, b2)      # hoisted out of the per-call path

    # Small case (single tile, grid=(1,))
    B = 8
    obs = jax.random.normal(okey1, (B, OBS_SIZE), jnp.float32)
    out = jax.block_until_ready(ppo_forward(obs, params))
    ref = reference_forward(obs, w1, b1, w2, b2)
    assert out.shape == (B, ACTION_SIZE)
    assert jnp.allclose(out, ref, atol=1e-5, rtol=1e-5), "mismatch vs JAX reference (B=8)"
    assert jnp.allclose(jnp.sum(out, axis=1), 1.0, atol=1e-5), "rows must sum to 1"

    # Multi-tile case to exercise the batch grid + padding path
    B2 = 300
    obs2 = jax.random.normal(okey2, (B2, OBS_SIZE), jnp.float32)
    out2 = jax.block_until_ready(ppo_forward(obs2, params, max_tb=128))  # grid=(3,)
    ref2 = reference_forward(obs2, w1, b1, w2, b2)
    assert out2.shape == (B2, ACTION_SIZE)
    assert jnp.allclose(out2, ref2, atol=1e-5, rtol=1e-5), "mismatch vs JAX reference (B=300)"
    assert jnp.allclose(jnp.sum(out2, axis=1), 1.0, atol=1e-5), "rows must sum to 1"

    print("KERNEL_OK")
</pallas_src>

<mosaic_0001>
module attributes {stable_mosaic.version = 11 : i64} {
  func.func @ppo_forward_kernel(%arg0: i32, %arg1: memref<6x128xf32, #tpu.memory_space<vmem>>, %arg2: memref<60x6xf32, #tpu.memory_space<vmem>>, %arg3: memref<60x1xf32, #tpu.memory_space<vmem>>, %arg4: memref<2x60xf32, #tpu.memory_space<vmem>>, %arg5: memref<2x1xf32, #tpu.memory_space<vmem>>, %arg6: memref<2x128xf32, #tpu.memory_space<vmem>>) attributes {dimension_semantics = [#tpu.dimension_semantics<parallel>], iteration_bounds = array<i64: 1>, scalar_prefetch = 0 : i64, scratch_operands = 0 : i64, tpu.core_type = #tpu.core_type<tc>, window_params = [{transform_indices = @transform_0, window_bounds = array<i64: 6, 128>}, {pipeline_mode = #tpu.pipeline_mode<synchronous>, transform_indices = @transform_1, window_bounds = array<i64: 60, 6>}, {pipeline_mode = #tpu.pipeline_mode<synchronous>, transform_indices = @transform_2, window_bounds = array<i64: 60, 1>}, {pipeline_mode = #tpu.pipeline_mode<synchronous>, transform_indices = @transform_3, window_bounds = array<i64: 2, 60>}, {pipeline_mode = #tpu.pipeline_mode<synchronous>, transform_indices = @transform_4, window_bounds = array<i64: 2, 1>}, {transform_indices = @transform_5, window_bounds = array<i64: 2, 128>}]} {
    %c0 = arith.constant 0 : index
    %c0_0 = arith.constant 0 : index
    %0 = vector.load %arg1[%c0, %c0_0] : memref<6x128xf32, #tpu.memory_space<vmem>>, vector<6x128xf32>
    %c0_1 = arith.constant 0 : index
    %c0_2 = arith.constant 0 : index
    %1 = vector.load %arg2[%c0_1, %c0_2] : memref<60x6xf32, #tpu.memory_space<vmem>>, vector<60x6xf32>
    %cst = arith.constant dense<0.000000e+00> : vector<60x128xf32>
    %2 = tpu.matmul %1, %0, %cst {dimension_numbers = #tpu.dot_dimension_numbers<[1], [0], [0], [1], [0, 0, 1, 1], [], []>} : vector<60x6xf32>, vector<6x128xf32>, vector<60x128xf32> -> vector<60x128xf32>
    %c0_3 = arith.constant 0 : index
    %c0_4 = arith.constant 0 : index
    %3 = vector.load %arg3[%c0_3, %c0_4] : memref<60x1xf32, #tpu.memory_space<vmem>>, vector<60x1xf32>
    %4 = vector.broadcast %3 : vector<60x1xf32> to vector<60x128xf32>
    %5 = arith.addf %2, %4 : vector<60x128xf32>
    %cst_5 = arith.constant 0.000000e+00 : f32
    %6 = vector.broadcast %cst_5 : f32 to vector<60x128xf32>
    %7 = arith.maximumf %5, %6 : vector<60x128xf32>
    %c0_6 = arith.constant 0 : index
    %c0_7 = arith.constant 0 : index
    %8 = vector.load %arg4[%c0_6, %c0_7] : memref<2x60xf32, #tpu.memory_space<vmem>>, vector<2x60xf32>
    %cst_8 = arith.constant dense<0.000000e+00> : vector<2x128xf32>
    %9 = tpu.matmul %8, %7, %cst_8 {dimension_numbers = #tpu.dot_dimension_numbers<[1], [0], [0], [1], [0, 0, 1, 1], [], []>} : vector<2x60xf32>, vector<60x128xf32>, vector<2x128xf32> -> vector<2x128xf32>
    %c0_9 = arith.constant 0 : index
    %c0_10 = arith.constant 0 : index
    %10 = vector.load %arg5[%c0_9, %c0_10] : memref<2x1xf32, #tpu.memory_space<vmem>>, vector<2x1xf32>
    %11 = vector.broadcast %10 : vector<2x1xf32> to vector<2x128xf32>
    %12 = arith.addf %9, %11 : vector<2x128xf32>
    %13 = vector.extract_strided_slice %12 {offsets = [1, 0], sizes = [1, 128], strides = [1, 1]} : vector<2x128xf32> to vector<1x128xf32>
    %14 = vector.extract_strided_slice %12 {offsets = [0, 0], sizes = [1, 128], strides = [1, 1]} : vector<2x128xf32> to vector<1x128xf32>
    %15 = arith.subf %13, %14 : vector<1x128xf32>
    %16 = math.exp %15 : vector<1x128xf32>
    %cst_11 = arith.constant 1.000000e+00 : f32
    %17 = vector.broadcast %cst_11 : f32 to vector<1x128xf32>
    %18 = arith.addf %17, %16 : vector<1x128xf32>
    %cst_12 = arith.constant 1.000000e+00 : f32
    %19 = vector.broadcast %cst_12 : f32 to vector<1x128xf32>
    %20 = arith.divf %19, %18 : vector<1x128xf32>
    %cst_13 = arith.constant 1.000000e+00 : f32
    %21 = vector.broadcast %cst_13 : f32 to vector<1x128xf32>
    %22 = arith.subf %21, %20 : vector<1x128xf32>
    %23 = tpu.concatenate %20, %22 in 0 : vector<1x128xf32>, vector<1x128xf32> -> vector<2x128xf32>
    %c0_14 = arith.constant 0 : index
    %c0_15 = arith.constant 0 : index
    %24 = vector.load %arg6[%c0_14, %c0_15] : memref<2x128xf32, #tpu.memory_space<vmem>>, vector<2x128xf32>
    tpu.vector_store %arg6[%c0_14, %c0_15], %23 {strides = array<i32>} : memref<2x128xf32, #tpu.memory_space<vmem>>, vector<2x128xf32>,
    return
  }
  func.func @transform_0(%arg0: i32) -> (i32, i32) {
    %c0_i32 = arith.constant 0 : i32
    %c0_i32_0 = arith.constant 0 : i32
    return %c0_i32, %arg0 : i32, i32
  }
  func.func @transform_1(%arg0: i32) -> (i32, i32) {
    %c0_i32 = arith.constant 0 : i32
    %c0_i32_0 = arith.constant 0 : i32
    %c0_i32_1 = arith.constant 0 : i32
    return %c0_i32, %c0_i32_0 : i32, i32
  }
  func.func @transform_2(%arg0: i32) -> (i32, i32) {
    %c0_i32 = arith.constant 0 : i32
    %c0_i32_0 = arith.constant 0 : i32
    %c0_i32_1 = arith.constant 0 : i32
    return %c0_i32, %c0_i32_0 : i32, i32
  }
  func.func @transform_3(%arg0: i32) -> (i32, i32) {
    %c0_i32 = arith.constant 0 : i32
    %c0_i32_0 = arith.constant 0 : i32
    %c0_i32_1 = arith.constant 0 : i32
    return %c0_i32, %c0_i32_0 : i32, i32
  }
  func.func @transform_4(%arg0: i32) -> (i32, i32) {
    %c0_i32 = arith.constant 0 : i32
    %c0_i32_0 = arith.constant 0 : i32
    %c0_i32_1 = arith.constant 0 : i32
    return %c0_i32, %c0_i32_0 : i32, i32
  }
  func.func @transform_5(%arg0: i32) -> (i32, i32) {
    %c0_i32 = arith.constant 0 : i32
    %c0_i32_0 = arith.constant 0 : i32
    return %c0_i32, %arg0 : i32, i32
  }
}

</mosaic_0001>

<bundles_post_ra>
// kernel: tpu_custom_call.1
= control target key start
LH: loop header
LB: loop body
LE: loop exit
PB: predicated region body
PF: predicated region fallthrough
CT: control target
= control target key end

     0   :  { %vm103_vm0 = vcmask 1045504   ;;  %vm78_vm1 = vcmask 48128   ;;  %v446_v4 = vmov 0   ;;  %s559_s0 = inlined_call_operand.vmem [shape: f32[6,128], index: 0, kind: input, shape index: {}]   ;;  %s560_s1 = inlined_call_operand.vmem [shape: f32[60,6], index: 1, kind: input, shape index: {}]   ;;  %s561_s2 = inlined_call_operand.vmem [shape: f32[60,1], index: 2, kind: input, shape index: {}]   ;;  %s562_s3 = inlined_call_operand.vmem [shape: f32[2,60], index: 3, kind: input, shape index: {}]   ;;  %s563_s4 = inlined_call_operand.vmem [shape: f32[2,1], index: 4, kind: input, shape index: {}]   ;;  %s564_s5 = inlined_call_operand.hbm [shape: f32[2,128], index: 5, kind: output, shape index: {}]  }
   0x1   :  { %v21_v0 = vld [vmem:[%s559_s0] sm:$0x3f]  ;;  %v23_v2 = vld [vmem:[%s560_s1 + $0x8] sm:$0xff]  ;;  %v24_v3 = vld [vmem:[%s560_s1 + $0x10] sm:$0xff]  ;;  %416 = vset.pattern.permute.xlu0 %v446_v4  ;;  %417 = vset.pattern.permute.xlu1 %v446_v4 }
   0x2   :  { %v22_v1 = vld [vmem:[%s560_s1] sm:$0xff]  ;;  %364 = vmatprep.subr.msk.mxu0 %vm103_vm0, %v21_v0  ;;  %v32_v6 = vld [vmem:[%s561_s2 + $0x10] sm:$0xff]  ;;  %v25_v7 = vld [vmem:[%s560_s1 + $0x18] sm:$0xff] }
   0x3   :  { %366 = vmatprep.mubr.msk.f32.mxu0 %vm78_vm1, %v22_v1  ;;  %365 = vmatpush3.msk.msra.mxu0 %vm103_vm0, %v21_v0  ;;  %v30_v5 = vld [vmem:[%s561_s2] sm:$0xff]  ;;  %v31_v9 = vld [vmem:[%s561_s2 + $0x8] sm:$0xff]  ;;  %v33_v10 = vld [vmem:[%s561_s2 + $0x18] sm:$0xff] }
   0x4   :  { %367 = vmatmul.mubr.msk.f32.vlgmr.msra.gmra.mrb[0].mxu0 %vm78_vm1, %v23_v2  ;;  %40 = vperm.xlu0 %416, %v30_v5   ;;  %v26_v8 = vld [vmem:[%s560_s1 + $0x20] sm:$0xff] }
   0x5   :  { %369 = vmatprep.mubr.msk.f32.mxu0 %vm78_vm1, %v24_v3  ;;  %50 = vperm.xlu1 %417, %v32_v6  }
   0x6   :  { %10 = vsyncpa [#allocation3], 0  ;;  %v27_v11 = vld [vmem:[%s560_s1 + $0x28] sm:$0xff]  ;;  %v28_v12 = vld [vmem:[%s560_s1 + $0x30] sm:$0xff]  ;;  %v447_v19 = vmov 0.0|0.0   ;;  %vm448_vm2 = vmmov 0  }
   0x7   :  { %v34_v13 = vld [vmem:[%s561_s2 + $0x20] sm:$0xff]  ;;  %v35_v14 = vld [vmem:[%s561_s2 + $0x28] sm:$0xff]  ;;  %v29_v15 = vld [vmem:[%s560_s1 + $0x38] sm:$0xf]  ;;  %397 = vmatprep.subr.bf16.mxu1 %v447_v19  ;;  %v449_v20 = vmov 0.0   ;;  %vm231_vm3 = vcmask 1043456  }
   0x8   :  { %370 = vmatmul.mubr.msk.f32.gmra.mrb[2].mxu0 %vm78_vm1, %v25_v7  ;;  %45 = vperm.xlu0 %416, %v31_v9   ;;  %v36_v16 = vld [vmem:[%s561_s2 + $0x30] sm:$0xff]  ;;  %v37_v17 = vld [vmem:[%s561_s2 + $0x38] sm:$0xf]  ;;  %v221_v18 = vld [vmem:[%s563_s4] sm:$0x3]  ;;  %vm450_vm4 = vmmov 1  }
   0x9   :  { %372 = vmatprep.mubr.msk.f32.mxu0 %vm78_vm1, %v26_v8  ;;  %55 = vperm.xlu1 %417, %v33_v10   ;;  %vm408_vm5 = vmpackc.low %vm231_vm3, %vm450_vm4  ;;  %v220_v57 = vld [vmem:[%s562_s3] sm:$0x3]  ;;  %vm227_vm6 = vcmask 490496   ;;  %s451_s4 = smov [#allocation2]   ;;  %vm318_vm7 = vcmask 1040384  }
   0xa   :  { %394 = vmatprep.mubr.msk.f32.mxu1 %vm448_vm2, %v449_v20  ;;  %s327_s27 = sshll.u32 %s451_s4, 4  ;;  %s328_s27 = int_to_ptr.vmem [resolvable:$true] %s327_s27 }
   0xb   :  { %s422_s3 = scalar_lea.vmem %s328_s27, 32  ;;  %p427_p1 = scmp.lt.s32.totalorder %s328_s27, %s328_s27 }
   0xc   :  { %373 = vmatmul.mubr.msk.f32.gmra.mrb[4].mxu0 %vm78_vm1, %v27_v11  ;;  %60 = vperm.xlu0 %416, %v34_v13   ;;  %p423_p0 = scmp.ne.s32.totalorder %s328_s27, %s422_s3  ;;  %p428_p2 = scmp.lt.s32.totalorder %s422_s3, %s422_s3 }
   0xd   :  { %375 = vmatprep.mubr.msk.f32.mxu0 %vm78_vm1, %v28_v12  ;;  %65 = vperm.xlu1 %417, %v35_v14  }
   0xe   :  { %p429_p3 = por %p428_p2, %p427_p1 }
  0x10   :  { %376 = vmatmul.mubr.msk.f32.gmra.mrb[6].mxu0 %vm78_vm1, %v29_v15  ;;  %70 = vperm.xlu0 %416, %v36_v16   ;;  %p430_p4 = pnand %p429_p3, %p423_p0 }
  0x11   :  { %75 = vperm.xlu1 %417, %v37_v17  }
  0x14   :  { %224 = vperm.xlu0 %416, %v221_v18  }
  0x83   :  { %v41_v21 = vpop.permute.xlu0 %40 }
  0x84   :  { %v51_v22 = vpop.permute.xlu1 %50 }
  0x87   :  { %v46_v23 = vpop.permute.xlu0 %45 }
  0x88   :  { %v56_v24 = vpop.permute.xlu1 %55 }
  0x8b   :  { %v61_v37 = vpop.permute.xlu0 %60 }
  0x8c   :  { %v66_v34 = vpop.permute.xlu1 %65 }
  0x8f   :  { %v71_v49 = vpop.permute.xlu0 %70 }
  0x90   :  { %v76_v46 = vpop.permute.xlu1 %75 }
  0x93   :  { %v225_v58 = vpop.permute.xlu0 %224 }
  0xd7   :  { %v368_v25 = vpop.f32.mrb[0].mxu0 }
  0xd8   :  { %v179_v26 = vadd.f32 %v368_v25, %v46_v23  ;;  %v173_v27 = vpop.f32.mrb[1].mxu0 }
  0xd9   :  { %v174_v28 = vadd.f32 %v173_v27, %v41_v21 }
  0xda   :  { %v213_v29 = vmax.f32 %v179_v26, 0.0 }
  0xdb   :  { %v212_v30 = vmax.f32 %v174_v28, 0.0  ;;  %v371_v31 = vpop.f32.mrb[2].mxu0 }
  0xdc   :  { %v189_v32 = vadd.f32 %v371_v31, %v56_v24  ;;  %v183_v33 = vpop.f32.mrb[3].mxu0 }
  0xdd   :  { %v184_v35 = vadd.f32 %v183_v33, %v51_v22  ;;  %v398_v36 = vpack.c.bf16 %v213_v29, %v212_v30 }
  0xde   :  { %v215_v38 = vmax.f32 %v189_v32, 0.0 }
  0xdf   :  { %v214_v39 = vmax.f32 %v184_v35, 0.0  ;;  %v374_v40 = vpop.f32.mrb[4].mxu0  ;;  %399 = vmatpush3.bf16.msra.mxu1 %v398_v36 }
  0xe0   :  { %v199_v41 = vadd.f32 %v374_v40, %v66_v34  ;;  %v193_v42 = vpop.f32.mrb[5].mxu0  ;;  %400 = vmatprep.subr.bf16.mxu1 %v447_v19 }
  0xe1   :  { %v401_v43 = vpack.c.bf16 %v215_v38, %v214_v39  ;;  %v194_v44 = vadd.f32 %v193_v42, %v61_v37 }
  0xe2   :  { %v217_v45 = vmax.f32 %v199_v41, 0.0 }
  0xe3   :  { %v216_v47 = vmax.f32 %v194_v44, 0.0  ;;  %v377_v48 = vpop.f32.mrb[6].mxu0  ;;  %402 = vmatpush3.bf16.msra.mxu1 %v401_v43 }
  0xe4   :  { %v209_v50 = vadd.f32 %v377_v48, %v76_v46  ;;  %v203_v51 = vpop.f32.mrb[7].mxu0  ;;  %403 = vmatprep.subr.bf16.mxu1 %v447_v19 }
  0xe5   :  { %v404_v52 = vpack.c.bf16 %v217_v45, %v216_v47  ;;  %v204_v53 = vadd.f32 %v203_v51, %v71_v49 }
  0xe6   :  { %v219_v54 = vmax.f32 %v209_v50, 0.0 }
  0xe7   :  { %v218_v55 = vmax.f32 %v204_v53, 0.0  ;;  %405 = vmatpush3.bf16.msra.mxu1 %v404_v52 }
  0xe8   :  { %406 = vmatprep.subr.bf16.mxu1 %v447_v19 }
  0xe9   :  { %v407_v56 = vpack.c.bf16 %v219_v54, %v218_v55 }
  0xeb   :  { %409 = vmatpush3.bf16.msk.msra.mxu1 %vm408_vm5, %v407_v56 }
  0xee   :  { %395 = vmatmul.mubr.msk.f32.vlgmr.msra.gmra.mrb[0].mxu1 %vm227_vm6, %v220_v57 }
 0x1c1   :  { %v301_v59 = vpop.f32.mrb[0].mxu1 }
 0x1c2   :  { %v302_v60 = vadd.f32 %v301_v59, %v225_v58  ;;  %v396_v61 = vpop.f32.mrb[1].mxu1 }
 0x1c4   :  { %v306_v62 = vrot.slane %v302_v60, 7 }
 0x1c6   :  { %v308_v63 = vsub.f32 %v302_v60, %v306_v62 }
 0x1c8   :  { %v309_v0 = vmul.f32 1.442695, %v308_v63 }
 0x1ca   :  { %418 = vpow2.f32 %v309_v0 }
 0x1d4   :  { %v419_v1 = vpop.eup %418 }
 0x1d5   :  { %v311_v2 = vadd.f32 1.0, %v419_v1 }
 0x1d7   :  { %420 = vrcp.f32 %v311_v2 }
 0x1e1   :  { %v421_v3 = vpop.eup %420 }
 0x1e2   :  { %v314_v4 = vsub.f32 1.0, %v421_v3  ;;  %v316_v5 = vrot.slane %v421_v3, 1 }
 0x1e4   :  { %v319_v6 = vsel %vm318_vm7, %v316_v5, %v314_v4 }
 0x1e5   :  { %320 = vst [vmem:[#allocation2] sm:$0x3] %v319_v6 }
 0x1e6   :  { %433 = shalt.err (!%p430_p4)
}
 0x1e7   :  { %s434_s30 = scalar_lea.hbm %s564_s5, 32 }
 0x1e8   :  { %p435_p5 = scmp.ne.s32.totalorder %s564_s5, %s434_s30  ;;  %p438_p6 = scmp.lt.u32.totalorder %s434_s30, %s564_s5 }
 0x1ea   :  { %p440_p7 = pnand %p438_p6, %p435_p5 }
 0x1ec   :  { %443 = shalt.err (!%p440_p7)
}
 0x1ed   :  { %330 = dma.vmem_to_hbm [thread:$0]  %s328_s27, 32, %s564_s5, [#allocation3]  }
 0x1ee   :  { %444 = dma.done.wait [#allocation3], 32  }
 0x1ef   :  { %445 = vsyncadd [#allocation3], 4294967264 }
 0x1f0   :  { %334 = vsyncpa [#allocation3], 1 }

</bundles_post_ra>
